<compile_context>
chip_gen: v7x
topology: tpu7x:2x2x1
jax: 0.10.0
libtpu: 0.0.40
codegen_flags: <defaults>
</compile_context>

<pallas_src>
import functools

import numpy as np
import jax
import jax.numpy as jnp
from jax.experimental import pallas as pl
from jax.experimental.pallas import tpu as pltpu

NUM_CLASSES = 4            # object categories (module's num_classes)
FOCAL_ALPHA = 0.25
FOCAL_GAMMA = 2            # int -> lowers to a multiply, no pow
EPS = 1e-7                 # guards GIoU divisions against degenerate boxes
# deformable-DETR HungarianMatcher default cost weights
COST_CLASS, COST_BBOX, COST_GIOU = 2.0, 5.0, 2.0

VMEM = pltpu.MemorySpace.VMEM
SMEM = pltpu.MemorySpace.SMEM


# ----------------------------------------------------------------------------
# shared in-kernel helpers
# ----------------------------------------------------------------------------
def _stable_sigmoid_parts(x):
    """One exp per element. Returns (sigmoid(x), log(1 + exp(-|x|)))."""
    e = jnp.exp(-jnp.abs(x))
    inv1pe = 1.0 / (1.0 + e)
    prob = jnp.where(x >= 0.0, inv1pe, e * inv1pe)
    return prob, jnp.log(1.0 + e)


# ----------------------------------------------------------------------------
# Pallas kernels
# ----------------------------------------------------------------------------
def _matcher_cost_kernel(logits_ref, pboxT_ref, toh_ref, tbox_ref, cost_ref, *,
                         alpha, gamma, c_class, c_bbox, c_giou):
    # blocks (batch dim squeezed): logits (Q, C), pboxT (4, Q), toh (T, C), tbox (T, 4)
    x = logits_ref[...].astype(jnp.float32)
    pb = pboxT_ref[...].astype(jnp.float32)
    oh = toh_ref[...].astype(jnp.float32)
    tb = tbox_ref[...].astype(jnp.float32)

    prob, _ = _stable_sigmoid_parts(x)
    neg = (1.0 - alpha) * (prob ** gamma) * (-jnp.log(1.0 - prob + 1e-8))
    pos = alpha * ((1.0 - prob) ** gamma) * (-jnp.log(prob + 1e-8))
    cls_diff = pos - neg                                         # (Q, C)

    # cost_class[t, q] = cls_diff[q, label_t]  -- one-hot gather as a single MXU matmul
    cost_class = jax.lax.dot_general(
        oh, cls_diff, dimension_numbers=(((1,), (1,)), ((), ())),
        preferred_element_type=jnp.float32)                      # (T, Q)

    # pairwise L1 between cxcywh boxes, (T, Q) with Q on lanes
    cost_bbox = (jnp.abs(tb[:, 0:1] - pb[0:1, :]) + jnp.abs(tb[:, 1:2] - pb[1:2, :]) +
                 jnp.abs(tb[:, 2:3] - pb[2:3, :]) + jnp.abs(tb[:, 3:4] - pb[3:4, :]))

    # pairwise generalized IoU (cxcywh -> xyxy)
    px1 = pb[0:1] - 0.5 * pb[2:3]; py1 = pb[1:2] - 0.5 * pb[3:4]
    px2 = pb[0:1] + 0.5 * pb[2:3]; py2 = pb[1:2] + 0.5 * pb[3:4]
    tx1 = tb[:, 0:1] - 0.5 * tb[:, 2:3]; ty1 = tb[:, 1:2] - 0.5 * tb[:, 3:4]
    tx2 = tb[:, 0:1] + 0.5 * tb[:, 2:3]; ty2 = tb[:, 1:2] + 0.5 * tb[:, 3:4]
    area_p = (px2 - px1) * (py2 - py1)                           # (1, Q)
    area_t = (tx2 - tx1) * (ty2 - ty1)                           # (T, 1)
    inter = (jnp.maximum(jnp.minimum(tx2, px2) - jnp.maximum(tx1, px1), 0.0) *
             jnp.maximum(jnp.minimum(ty2, py2) - jnp.maximum(ty1, py1), 0.0))
    union = area_t + area_p - inter
    iou = inter / (union + EPS)
    area_c = (jnp.maximum(jnp.maximum(tx2, px2) - jnp.minimum(tx1, px1), 0.0) *
              jnp.maximum(jnp.maximum(ty2, py2) - jnp.minimum(ty1, py1), 0.0))
    giou = iou - (area_c - union) / (area_c + EPS)

    cost_ref[...] = c_bbox * cost_bbox + c_class * cost_class + c_giou * (-giou)


def _fused_loss_kernel(logits_ref, tclass_ref, tlen_ref, sbox_ref, tbox_ref,
                       nb_ref, nm_ref, out_ref, *, num_classes, alpha, gamma):
    # out_ref (SMEM f32[5]) = [loss_ce, class_error, cardinality_error, loss_bbox, loss_giou]
    x = logits_ref[...].astype(jnp.float32)                      # (B, Q, C)
    tc = tclass_ref[...].astype(jnp.float32)                     # (B, Q, 1)
    b_dim, _, c_dim = x.shape
    nb = nb_ref[0]

    # ---- focal (sigmoid) classification loss; one-hot built in-kernel ----
    cls_iota = jax.lax.broadcasted_iota(
        jnp.int32, (b_dim, x.shape[1], c_dim), 2).astype(jnp.float32)
    # matches the module's scatter into C+1 columns followed by dropping the last column:
    # classes >= C (the "no object" fill num_classes+1) yield an all-zero row.
    t = (cls_iota == tc).astype(jnp.float32)
    prob, log1pe = _stable_sigmoid_parts(x)
    ce = jnp.maximum(x, 0.0) - x * t + log1pe                    # stable BCE-with-logits
    p_t = prob * t + (1.0 - prob) * (1.0 - t)
    loss = ce * ((1.0 - p_t) ** gamma)
    alpha_t = alpha * t + (1.0 - alpha) * (1.0 - t)
    out_ref[0] = jnp.sum(alpha_t * loss) / nb                    # == sigmoid_focal_loss * Q

    # ---- first-occurrence argmax over classes (shared by class_error & cardinality) ----
    row_max = jnp.max(x, axis=-1, keepdims=True)
    amax = jnp.min(jnp.where(x >= row_max, cls_iota, float(c_dim)),
                   axis=-1, keepdims=True)                       # (B, Q, 1) f32

    # ---- class_error over matched queries ----
    matched = (tc != float(num_classes + 1)).astype(jnp.float32)
    correct = matched * (amax == tc).astype(jnp.float32)
    n_match = jnp.maximum(jnp.sum(matched), 1.0)
    out_ref[1] = 100.0 - 100.0 * jnp.sum(correct) / n_match

    # ---- cardinality error (argmax != no-object), vectorized across the whole batch ----
    not_noobj = (amax != float(c_dim - 1)).astype(jnp.float32)   # (B, Q, 1)
    card = jnp.sum(not_noobj, axis=1)                            # (B, 1)
    out_ref[2] = jnp.sum(jnp.abs(card - tlen_ref[...])) / b_dim  # F.l1_loss (mean over B)

    # ---- matched-box L1 + GIoU; boxes laid out (4, Npad) with N on lanes ----
    s = sbox_ref[...].astype(jnp.float32)
    tb = tbox_ref[...].astype(jnp.float32)
    n_pad = s.shape[1]
    lane = jax.lax.broadcasted_iota(jnp.int32, (1, n_pad), 1)
    valid = (lane < nm_ref[0]).astype(jnp.float32)               # padding rows masked exactly
    out_ref[3] = jnp.sum(jnp.abs(s - tb) * valid) / nb

    sx1 = s[0:1] - 0.5 * s[2:3]; sy1 = s[1:2] - 0.5 * s[3:4]
    sx2 = s[0:1] + 0.5 * s[2:3]; sy2 = s[1:2] + 0.5 * s[3:4]
    tx1 = tb[0:1] - 0.5 * tb[2:3]; ty1 = tb[1:2] - 0.5 * tb[3:4]
    tx2 = tb[0:1] + 0.5 * tb[2:3]; ty2 = tb[1:2] + 0.5 * tb[3:4]
    area_s = (sx2 - sx1) * (sy2 - sy1)
    area_t = (tx2 - tx1) * (ty2 - ty1)
    inter = (jnp.maximum(jnp.minimum(sx2, tx2) - jnp.maximum(sx1, tx1), 0.0) *
             jnp.maximum(jnp.minimum(sy2, ty2) - jnp.maximum(sy1, ty1), 0.0))
    union = area_s + area_t - inter
    iou = inter / (union + EPS)
    area_c = (jnp.maximum(jnp.maximum(sx2, tx2) - jnp.minimum(sx1, tx1), 0.0) *
              jnp.maximum(jnp.maximum(sy2, ty2) - jnp.minimum(sy1, ty1), 0.0))
    giou = iou - (area_c - union) / (area_c + EPS)
    out_ref[4] = jnp.sum((1.0 - giou) * valid) / nb


# ----------------------------------------------------------------------------
# pallas_call wrappers (no wrapper-side dtype casts; kernels upcast on load)
# ----------------------------------------------------------------------------
def matcher_cost_pallas(pred_logits, pred_boxes_t, tgt_onehot, tgt_boxes):
    b_dim, q_dim, c_dim = pred_logits.shape
    t_pad = tgt_onehot.shape[1]
    kern = functools.partial(_matcher_cost_kernel, alpha=FOCAL_ALPHA, gamma=FOCAL_GAMMA,
                             c_class=COST_CLASS, c_bbox=COST_BBOX, c_giou=COST_GIOU)
    return pl.pallas_call(
        kern,
        out_shape=jax.ShapeDtypeStruct((b_dim, t_pad, q_dim), jnp.float32),
        grid=(b_dim,),
        in_specs=[pl.BlockSpec((pl.Squeezed(), q_dim, c_dim), lambda b: (b, 0, 0)),
                  pl.BlockSpec((pl.Squeezed(), 4, q_dim), lambda b: (b, 0, 0)),
                  pl.BlockSpec((pl.Squeezed(), t_pad, c_dim), lambda b: (b, 0, 0)),
                  pl.BlockSpec((pl.Squeezed(), t_pad, 4), lambda b: (b, 0, 0))],
        out_specs=pl.BlockSpec((pl.Squeezed(), t_pad, q_dim), lambda b: (b, 0, 0)),
        compiler_params=pltpu.CompilerParams(
            dimension_semantics=("parallel",),       # batch items independent -> v7x megacore
            vmem_limit_bytes=32 * 1024 * 1024),
    )(pred_logits, pred_boxes_t, tgt_onehot, tgt_boxes)


def fused_loss_pallas(pred_logits, target_classes, tgt_len, src_boxes_t, tgt_boxes_t,
                      num_boxes, n_matched):
    b_dim, q_dim, c_dim = pred_logits.shape
    nb = jnp.asarray([num_boxes], jnp.float32)
    nm = jnp.asarray([n_matched], jnp.int32)
    kern = functools.partial(_fused_loss_kernel, num_classes=NUM_CLASSES,
                             alpha=FOCAL_ALPHA, gamma=FOCAL_GAMMA)
    n_el = b_dim * q_dim * c_dim
    n_box = int(src_boxes_t.shape[1])
    cost = pl.CostEstimate(
        flops=40 * n_el + 60 * n_box,
        transcendentals=2 * n_el,                    # one exp + one log per logit
        bytes_accessed=int(pred_logits.size) * pred_logits.dtype.itemsize
                       + int(target_classes.size) * 4 + 8 * 4 * n_box + 64)
    # TODO(synk): for production DETR shapes (Q~300, aux heads) add a (B, Q-tile) grid with
    # SMEM accumulators instead of whole-array blocks; at these sizes one block is fastest.
    return pl.pallas_call(
        kern,
        out_shape=jax.ShapeDtypeStruct((5,), jnp.float32),
        in_specs=[pl.BlockSpec(memory_space=VMEM),   # pred_logits  (B, Q, C), model dtype
                  pl.BlockSpec(memory_space=VMEM),   # target class (B, Q, 1) int32
                  pl.BlockSpec(memory_space=VMEM),   # tgt lengths  (B, 1)    f32
                  pl.BlockSpec(memory_space=VMEM),   # matched src boxes (4, Npad)
                  pl.BlockSpec(memory_space=VMEM),   # matched tgt boxes (4, Npad)
                  pl.BlockSpec(memory_space=SMEM),   # num_boxes (1,) f32
                  pl.BlockSpec(memory_space=SMEM)],  # n_matched (1,) int32
        out_specs=pl.BlockSpec(memory_space=SMEM),
        compiler_params=pltpu.CompilerParams(vmem_limit_bytes=32 * 1024 * 1024),
        cost_estimate=cost,
    )(pred_logits, target_classes, tgt_len, src_boxes_t, tgt_boxes_t, nb, nm)


# ----------------------------------------------------------------------------
# Exact assignment on host (replaces scipy.linear_sum_assignment; no factorial search)
# ----------------------------------------------------------------------------
def _optimal_assignment(cost):
    """Exact min-cost query->target assignment via DP over target subsets (T small).
    Returns (row_ind, col_ind) with row_ind ascending, like scipy."""
    q_dim, t_dim = cost.shape
    full = 1 << t_dim
    dp = np.full((q_dim + 1, full), np.inf, np.float64)
    choice = np.full((q_dim + 1, full), -2, np.int64)
    dp[0, 0] = 0.0
    for i in range(q_dim):
        for mask in range(full):
            base = dp[i, mask]
            if not np.isfinite(base):
                continue
            if base < dp[i + 1, mask]:               # query i left unmatched
                dp[i + 1, mask] = base
                choice[i + 1, mask] = -1
            for j in range(t_dim):                   # query i matched to target j
                if mask & (1 << j):
                    continue
                nmask = mask | (1 << j)
                v = base + float(cost[i, j])
                if v < dp[i + 1, nmask]:
                    dp[i + 1, nmask] = v
                    choice[i + 1, nmask] = j
    src, tgt, mask = [], [], full - 1
    for i in range(q_dim, 0, -1):
        j = choice[i, mask]
        if j >= 0:
            src.append(i - 1)
            tgt.append(j)
            mask ^= (1 << j)
    return np.asarray(src[::-1], np.int64), np.asarray(tgt[::-1], np.int64)


def hungarian_matcher_indices(cost_np, n_tgt):
    indices = []
    for b, t_n in enumerate(n_tgt):
        if t_n == 0:
            indices.append((np.zeros(0, np.int64), np.zeros(0, np.int64)))
            continue
        src, tgt = _optimal_assignment(cost_np[b, :t_n, :].T)    # (Q, T) view
        indices.append((src, tgt))
    return indices


# ----------------------------------------------------------------------------
# SetCriterion.forward
# ----------------------------------------------------------------------------
def set_criterion_forward(outputs, targets):
    pred_logits = outputs['pred_logits']                         # (B, Q, C)
    pred_boxes = outputs['pred_boxes']                           # (B, Q, 4)
    b_dim, q_dim, c_dim = pred_logits.shape

    # Host copies of the (tiny) targets -- needed for the assignment itself.
    labels_np = [np.asarray(t['labels']).astype(np.int64) for t in targets]
    boxes_np = [np.asarray(t['boxes'], dtype=np.float32).reshape(-1, 4) for t in targets]
    n_tgt = [int(l.shape[0]) for l in labels_np]
    t_pad = max(8, max(n_tgt) if n_tgt else 1)                   # full-sublane target axis

    toh = np.zeros((b_dim, t_pad, c_dim), np.float32)            # padded target one-hots
    tbox = np.full((b_dim, t_pad, 4), 0.25, np.float32)          # dummy boxes in padded rows
    for b in range(b_dim):
        for j in range(n_tgt[b]):
            toh[b, j, int(labels_np[b][j])] = 1.0
            tbox[b, j] = boxes_np[b][j]

    # 1) matcher cost matrix on device: lane-dense (T, Q) per image.
    pbox_t = jnp.swapaxes(pred_boxes, 1, 2)                      # (B, 4, Q)
    cost_dev = matcher_cost_pallas(pred_logits, pbox_t, jnp.asarray(toh), jnp.asarray(tbox))

    # 2) assignment on host -- the single blocking device->host fetch.
    # TODO(synk): scipy.linear_sum_assignment has no Pallas/lax equivalent; exact subset-DP here.
    cost_np = np.asarray(cost_dev)
    indices = hungarian_matcher_indices(cost_np, n_tgt)

    num_boxes = max(float(sum(n_tgt)), 1.0)                      # world_size == 1, no all_reduce

    # Per-query target class; num_classes+1 is the module's "no object" fill (dropped column).
    target_classes = np.full((b_dim, q_dim), NUM_CLASSES + 1, np.int32)
    batch_idx, src_idx, tgt_box_rows = [], [], []
    for b, (src, tgt) in enumerate(indices):
        if src.shape[0] == 0:
            continue
        target_classes[b, src] = labels_np[b][tgt]
        batch_idx.append(np.full(src.shape, b, np.int32))
        src_idx.append(src.astype(np.int32))
        tgt_box_rows.append(boxes_np[b][tgt])
    n_match = int(sum(s.shape[0] for s, _ in indices))
    n_pad = max(8, n_match)

    # Matched boxes in (4, Npad) layout (N on lanes); padding masked inside the kernel.
    tbox_m = np.zeros((4, n_pad), np.float32)
    if n_match:
        batch_idx = np.concatenate(batch_idx)
        src_idx = np.concatenate(src_idx)
        tbox_m[:, :n_match] = np.concatenate(tgt_box_rows, axis=0).T
        src_gather = pred_boxes[jnp.asarray(batch_idx), jnp.asarray(src_idx)]   # (Nm, 4)
        sbox_m = jnp.zeros((4, n_pad), jnp.float32).at[:, :n_match].set(
            jnp.swapaxes(src_gather.astype(jnp.float32), 0, 1))
    else:
        sbox_m = jnp.zeros((4, n_pad), jnp.float32)

    tgt_len = jnp.asarray(np.asarray(n_tgt, np.float32).reshape(b_dim, 1))
    tclass = jnp.asarray(target_classes.reshape(b_dim, q_dim, 1))

    # 3) everything else in ONE fused kernel.
    out = fused_loss_pallas(pred_logits, tclass, tgt_len, sbox_m, jnp.asarray(tbox_m),
                            num_boxes, n_match)

    # TODO(synk): 'aux_outputs' / 'enc_outputs' heads would simply re-run the same two kernels.
    return {'loss_ce': out[0], 'class_error': out[1], 'cardinality_error': out[2],
            'loss_bbox': out[3], 'loss_giou': out[4]}


# ----------------------------------------------------------------------------
if __name__ == "__main__":
    key = jax.random.PRNGKey(0)
    B, Q = 2, 8
    C = NUM_CLASSES + 1      # object classes + trailing "no-object" logit
    k1, k2, k3, k4, k5 = jax.random.split(key, 5)

    pred_logits = jax.random.normal(k1, (B, Q, C), jnp.float32)
    pred_boxes = jnp.concatenate(
        [jax.random.uniform(k2, (B, Q, 2), minval=0.2, maxval=0.8),
         jax.random.uniform(k3, (B, Q, 2), minval=0.1, maxval=0.4)],
        axis=-1).astype(jnp.float32)
    outputs = {'pred_logits': pred_logits, 'pred_boxes': pred_boxes}

    n_per_img = [3, 2]
    targets = []
    lkeys = jax.random.split(k4, B)
    bkeys = jax.random.split(k5, B)
    for b in range(B):
        labels = jax.random.randint(lkeys[b], (n_per_img[b],), 0, NUM_CLASSES)
        boxes = jnp.concatenate(
            [jax.random.uniform(bkeys[b], (n_per_img[b], 2), minval=0.3, maxval=0.7),
             jax.random.uniform(jax.random.fold_in(bkeys[b], 1), (n_per_img[b], 2),
                                minval=0.1, maxval=0.3)],
            axis=-1).astype(jnp.float32)
        targets.append({'labels': labels, 'boxes': boxes})

    losses = set_criterion_forward(outputs, targets)
    losses = {k: jax.block_until_ready(v) for k, v in losses.items()}
    for name, val in losses.items():
        assert bool(jnp.isfinite(val)), f"non-finite loss: {name}"
    print("KERNEL_OK")
</pallas_src>

<mosaic_0001>
module attributes {stable_mosaic.version = 11 : i64} {
  func.func @_matcher_cost_kernel(%arg0: i32, %arg1: memref<1x8x5xf32, #tpu.memory_space<vmem>>, %arg2: memref<1x4x8xf32, #tpu.memory_space<vmem>>, %arg3: memref<1x8x5xf32, #tpu.memory_space<vmem>>, %arg4: memref<1x8x4xf32, #tpu.memory_space<vmem>>, %arg5: memref<1x8x8xf32, #tpu.memory_space<vmem>>) attributes {dimension_semantics = [#tpu.dimension_semantics<parallel>], iteration_bounds = array<i64: 2>, scalar_prefetch = 0 : i64, scratch_operands = 0 : i64, tpu.core_type = #tpu.core_type<tc>, window_params = [{transform_indices = @transform_0, window_bounds = array<i64: 1, 8, 5>}, {transform_indices = @transform_1, window_bounds = array<i64: 1, 4, 8>}, {transform_indices = @transform_2, window_bounds = array<i64: 1, 8, 5>}, {transform_indices = @transform_3, window_bounds = array<i64: 1, 8, 4>}, {transform_indices = @transform_4, window_bounds = array<i64: 1, 8, 8>}]} {
    %c0 = arith.constant 0 : index
    %c0_0 = arith.constant 0 : index
    %c0_1 = arith.constant 0 : index
    %0 = vector.load %arg1[%c0, %c0_0, %c0_1] : memref<1x8x5xf32, #tpu.memory_space<vmem>>, vector<1x8x5xf32>
    %1 = vector.shape_cast %0 : vector<1x8x5xf32> to vector<8x5xf32>
    %c0_2 = arith.constant 0 : index
    %c0_3 = arith.constant 0 : index
    %c0_4 = arith.constant 0 : index
    %2 = vector.load %arg2[%c0_2, %c0_3, %c0_4] : memref<1x4x8xf32, #tpu.memory_space<vmem>>, vector<1x4x8xf32>
    %3 = vector.shape_cast %2 : vector<1x4x8xf32> to vector<4x8xf32>
    %c0_5 = arith.constant 0 : index
    %c0_6 = arith.constant 0 : index
    %c0_7 = arith.constant 0 : index
    %4 = vector.load %arg3[%c0_5, %c0_6, %c0_7] : memref<1x8x5xf32, #tpu.memory_space<vmem>>, vector<1x8x5xf32>
    %5 = vector.shape_cast %4 : vector<1x8x5xf32> to vector<8x5xf32>
    %c0_8 = arith.constant 0 : index
    %c0_9 = arith.constant 0 : index
    %c0_10 = arith.constant 0 : index
    %6 = vector.load %arg4[%c0_8, %c0_9, %c0_10] : memref<1x8x4xf32, #tpu.memory_space<vmem>>, vector<1x8x4xf32>
    %7 = vector.shape_cast %6 : vector<1x8x4xf32> to vector<8x4xf32>
    %8 = math.absf %1 : vector<8x5xf32>
    %cst = arith.constant 0.000000e+00 : f32
    %9 = vector.broadcast %cst : f32 to vector<8x5xf32>
    %10 = arith.subf %9, %8 : vector<8x5xf32>
    %11 = math.exp %10 : vector<8x5xf32>
    %cst_11 = arith.constant 1.000000e+00 : f32
    %12 = vector.broadcast %cst_11 : f32 to vector<8x5xf32>
    %13 = arith.addf %12, %11 : vector<8x5xf32>
    %cst_12 = arith.constant 1.000000e+00 : f32
    %14 = vector.broadcast %cst_12 : f32 to vector<8x5xf32>
    %15 = arith.divf %14, %13 : vector<8x5xf32>
    %cst_13 = arith.constant 0.000000e+00 : f32
    %16 = vector.broadcast %cst_13 : f32 to vector<8x5xf32>
    %17 = arith.cmpf oge, %1, %16 : vector<8x5xf32>
    %18 = arith.mulf %11, %15 : vector<8x5xf32>
    %19 = arith.select %17, %15, %18 : vector<8x5xi1>, vector<8x5xf32>
    %20 = arith.mulf %19, %19 : vector<8x5xf32>
    %cst_14 = arith.constant 7.500000e-01 : f32
    %21 = vector.broadcast %cst_14 : f32 to vector<8x5xf32>
    %22 = arith.mulf %21, %20 : vector<8x5xf32>
    %cst_15 = arith.constant 1.000000e+00 : f32
    %23 = vector.broadcast %cst_15 : f32 to vector<8x5xf32>
    %24 = arith.subf %23, %19 : vector<8x5xf32>
    %cst_16 = arith.constant 9.99999993E-9 : f32
    %25 = vector.broadcast %cst_16 : f32 to vector<8x5xf32>
    %26 = arith.addf %24, %25 : vector<8x5xf32>
    %27 = math.log %26 : vector<8x5xf32>
    %cst_17 = arith.constant 0.000000e+00 : f32
    %28 = vector.broadcast %cst_17 : f32 to vector<8x5xf32>
    %29 = arith.subf %28, %27 : vector<8x5xf32>
    %30 = arith.mulf %22, %29 : vector<8x5xf32>
    %cst_18 = arith.constant 1.000000e+00 : f32
    %31 = vector.broadcast %cst_18 : f32 to vector<8x5xf32>
    %32 = arith.subf %31, %19 : vector<8x5xf32>
    %33 = arith.mulf %32, %32 : vector<8x5xf32>
    %cst_19 = arith.constant 2.500000e-01 : f32
    %34 = vector.broadcast %cst_19 : f32 to vector<8x5xf32>
    %35 = arith.mulf %34, %33 : vector<8x5xf32>
    %cst_20 = arith.constant 9.99999993E-9 : f32
    %36 = vector.broadcast %cst_20 : f32 to vector<8x5xf32>
    %37 = arith.addf %19, %36 : vector<8x5xf32>
    %38 = math.log %37 : vector<8x5xf32>
    %cst_21 = arith.constant 0.000000e+00 : f32
    %39 = vector.broadcast %cst_21 : f32 to vector<8x5xf32>
    %40 = arith.subf %39, %38 : vector<8x5xf32>
    %41 = arith.mulf %35, %40 : vector<8x5xf32>
    %42 = arith.subf %41, %30 : vector<8x5xf32>
    %cst_22 = arith.constant dense<0.000000e+00> : vector<8x8xf32>
    %43 = tpu.matmul %5, %42, %cst_22 {dimension_numbers = #tpu.dot_dimension_numbers<[1], [1], [0], [0], [0, 0, 1, 0], [], []>} : vector<8x5xf32>, vector<8x5xf32>, vector<8x8xf32> -> vector<8x8xf32>
    %44 = vector.extract_strided_slice %7 {offsets = [0, 0], sizes = [8, 1], strides = [1, 1]} : vector<8x4xf32> to vector<8x1xf32>
    %45 = vector.extract_strided_slice %3 {offsets = [0, 0], sizes = [1, 8], strides = [1, 1]} : vector<4x8xf32> to vector<1x8xf32>
    %46 = vector.broadcast %44 : vector<8x1xf32> to vector<8x8xf32>
    %47 = vector.broadcast %45 : vector<1x8xf32> to vector<8x8xf32>
    %48 = arith.subf %46, %47 : vector<8x8xf32>
    %49 = math.absf %48 : vector<8x8xf32>
    %50 = vector.extract_strided_slice %7 {offsets = [0, 1], sizes = [8, 1], strides = [1, 1]} : vector<8x4xf32> to vector<8x1xf32>
    %51 = vector.extract_strided_slice %3 {offsets = [1, 0], sizes = [1, 8], strides = [1, 1]} : vector<4x8xf32> to vector<1x8xf32>
    %52 = vector.broadcast %50 : vector<8x1xf32> to vector<8x8xf32>
    %53 = vector.broadcast %51 : vector<1x8xf32> to vector<8x8xf32>
    %54 = arith.subf %52, %53 : vector<8x8xf32>
    %55 = math.absf %54 : vector<8x8xf32>
    %56 = arith.addf %49, %55 : vector<8x8xf32>
    %57 = vector.extract_strided_slice %7 {offsets = [0, 2], sizes = [8, 1], strides = [1, 1]} : vector<8x4xf32> to vector<8x1xf32>
    %58 = vector.extract_strided_slice %3 {offsets = [2, 0], sizes = [1, 8], strides = [1, 1]} : vector<4x8xf32> to vector<1x8xf32>
    %59 = vector.broadcast %57 : vector<8x1xf32> to vector<8x8xf32>
    %60 = vector.broadcast %58 : vector<1x8xf32> to vector<8x8xf32>
    %61 = arith.subf %59, %60 : vector<8x8xf32>
    %62 = math.absf %61 : vector<8x8xf32>
    %63 = arith.addf %56, %62 : vector<8x8xf32>
    %64 = vector.extract_strided_slice %7 {offsets = [0, 3], sizes = [8, 1], strides = [1, 1]} : vector<8x4xf32> to vector<8x1xf32>
    %65 = vector.extract_strided_slice %3 {offsets = [3, 0], sizes = [1, 8], strides = [1, 1]} : vector<4x8xf32> to vector<1x8xf32>
    %66 = vector.broadcast %64 : vector<8x1xf32> to vector<8x8xf32>
    %67 = vector.broadcast %65 : vector<1x8xf32> to vector<8x8xf32>
    %68 = arith.subf %66, %67 : vector<8x8xf32>
    %69 = math.absf %68 : vector<8x8xf32>
    %70 = arith.addf %63, %69 : vector<8x8xf32>
    %71 = vector.extract_strided_slice %3 {offsets = [0, 0], sizes = [1, 8], strides = [1, 1]} : vector<4x8xf32> to vector<1x8xf32>
    %72 = vector.extract_strided_slice %3 {offsets = [2, 0], sizes = [1, 8], strides = [1, 1]} : vector<4x8xf32> to vector<1x8xf32>
    %cst_23 = arith.constant 5.000000e-01 : f32
    %73 = vector.broadcast %cst_23 : f32 to vector<1x8xf32>
    %74 = arith.mulf %73, %72 : vector<1x8xf32>
    %75 = arith.subf %71, %74 : vector<1x8xf32>
    %76 = vector.extract_strided_slice %3 {offsets = [1, 0], sizes = [1, 8], strides = [1, 1]} : vector<4x8xf32> to vector<1x8xf32>
    %77 = vector.extract_strided_slice %3 {offsets = [3, 0], sizes = [1, 8], strides = [1, 1]} : vector<4x8xf32> to vector<1x8xf32>
    %cst_24 = arith.constant 5.000000e-01 : f32
    %78 = vector.broadcast %cst_24 : f32 to vector<1x8xf32>
    %79 = arith.mulf %78, %77 : vector<1x8xf32>
    %80 = arith.subf %76, %79 : vector<1x8xf32>
    %81 = vector.extract_strided_slice %3 {offsets = [0, 0], sizes = [1, 8], strides = [1, 1]} : vector<4x8xf32> to vector<1x8xf32>
    %82 = vector.extract_strided_slice %3 {offsets = [2, 0], sizes = [1, 8], strides = [1, 1]} : vector<4x8xf32> to vector<1x8xf32>
    %cst_25 = arith.constant 5.000000e-01 : f32
    %83 = vector.broadcast %cst_25 : f32 to vector<1x8xf32>
    %84 = arith.mulf %83, %82 : vector<1x8xf32>
    %85 = arith.addf %81, %84 : vector<1x8xf32>
    %86 = vector.extract_strided_slice %3 {offsets = [1, 0], sizes = [1, 8], strides = [1, 1]} : vector<4x8xf32> to vector<1x8xf32>
    %87 = vector.extract_strided_slice %3 {offsets = [3, 0], sizes = [1, 8], strides = [1, 1]} : vector<4x8xf32> to vector<1x8xf32>
    %cst_26 = arith.constant 5.000000e-01 : f32
    %88 = vector.broadcast %cst_26 : f32 to vector<1x8xf32>
    %89 = arith.mulf %88, %87 : vector<1x8xf32>
    %90 = arith.addf %86, %89 : vector<1x8xf32>
    %91 = vector.extract_strided_slice %7 {offsets = [0, 0], sizes = [8, 1], strides = [1, 1]} : vector<8x4xf32> to vector<8x1xf32>
    %92 = vector.extract_strided_slice %7 {offsets = [0, 2], sizes = [8, 1], strides = [1, 1]} : vector<8x4xf32> to vector<8x1xf32>
    %cst_27 = arith.constant 5.000000e-01 : f32
    %93 = vector.broadcast %cst_27 : f32 to vector<8x1xf32>
    %94 = arith.mulf %93, %92 : vector<8x1xf32>
    %95 = arith.subf %91, %94 : vector<8x1xf32>
    %96 = vector.extract_strided_slice %7 {offsets = [0, 1], sizes = [8, 1], strides = [1, 1]} : vector<8x4xf32> to vector<8x1xf32>
    %97 = vector.extract_strided_slice %7 {offsets = [0, 3], sizes = [8, 1], strides = [1, 1]} : vector<8x4xf32> to vector<8x1xf32>
    %cst_28 = arith.constant 5.000000e-01 : f32
    %98 = vector.broadcast %cst_28 : f32 to vector<8x1xf32>
    %99 = arith.mulf %98, %97 : vector<8x1xf32>
    %100 = arith.subf %96, %99 : vector<8x1xf32>
    %101 = vector.extract_strided_slice %7 {offsets = [0, 0], sizes = [8, 1], strides = [1, 1]} : vector<8x4xf32> to vector<8x1xf32>
    %102 = vector.extract_strided_slice %7 {offsets = [0, 2], sizes = [8, 1], strides = [1, 1]} : vector<8x4xf32> to vector<8x1xf32>
    %cst_29 = arith.constant 5.000000e-01 : f32
    %103 = vector.broadcast %cst_29 : f32 to vector<8x1xf32>
    %104 = arith.mulf %103, %102 : vector<8x1xf32>
    %105 = arith.addf %101, %104 : vector<8x1xf32>
    %106 = vector.extract_strided_slice %7 {offsets = [0, 1], sizes = [8, 1], strides = [1, 1]} : vector<8x4xf32> to vector<8x1xf32>
    %107 = vector.extract_strided_slice %7 {offsets = [0, 3], sizes = [8, 1], strides = [1, 1]} : vector<8x4xf32> to vector<8x1xf32>
    %cst_30 = arith.constant 5.000000e-01 : f32
    %108 = vector.broadcast %cst_30 : f32 to vector<8x1xf32>
    %109 = arith.mulf %108, %107 : vector<8x1xf32>
    %110 = arith.addf %106, %109 : vector<8x1xf32>
    %111 = arith.subf %85, %75 : vector<1x8xf32>
    %112 = arith.subf %90, %80 : vector<1x8xf32>
    %113 = arith.mulf %111, %112 : vector<1x8xf32>
    %114 = arith.subf %105, %95 : vector<8x1xf32>
    %115 = arith.subf %110, %100 : vector<8x1xf32>
    %116 = arith.mulf %114, %115 : vector<8x1xf32>
    %117 = vector.broadcast %105 : vector<8x1xf32> to vector<8x8xf32>
    %118 = vector.broadcast %85 : vector<1x8xf32> to vector<8x8xf32>
    %119 = arith.minimumf %117, %118 : vector<8x8xf32>
    %120 = vector.broadcast %95 : vector<8x1xf32> to vector<8x8xf32>
    %121 = vector.broadcast %75 : vector<1x8xf32> to vector<8x8xf32>
    %122 = arith.maximumf %120, %121 : vector<8x8xf32>
    %123 = arith.subf %119, %122 : vector<8x8xf32>
    %cst_31 = arith.constant 0.000000e+00 : f32
    %124 = vector.broadcast %cst_31 : f32 to vector<8x8xf32>
    %125 = arith.maximumf %123, %124 : vector<8x8xf32>
    %126 = vector.broadcast %110 : vector<8x1xf32> to vector<8x8xf32>
    %127 = vector.broadcast %90 : vector<1x8xf32> to vector<8x8xf32>
    %128 = arith.minimumf %126, %127 : vector<8x8xf32>
    %129 = vector.broadcast %100 : vector<8x1xf32> to vector<8x8xf32>
    %130 = vector.broadcast %80 : vector<1x8xf32> to vector<8x8xf32>
    %131 = arith.maximumf %129, %130 : vector<8x8xf32>
    %132 = arith.subf %128, %131 : vector<8x8xf32>
    %cst_32 = arith.constant 0.000000e+00 : f32
    %133 = vector.broadcast %cst_32 : f32 to vector<8x8xf32>
    %134 = arith.maximumf %132, %133 : vector<8x8xf32>
    %135 = arith.mulf %125, %134 : vector<8x8xf32>
    %136 = vector.broadcast %116 : vector<8x1xf32> to vector<8x8xf32>
    %137 = vector.broadcast %113 : vector<1x8xf32> to vector<8x8xf32>
    %138 = arith.addf %136, %137 : vector<8x8xf32>
    %139 = arith.subf %138, %135 : vector<8x8xf32>
    %cst_33 = arith.constant 1.000000e-07 : f32
    %140 = vector.broadcast %cst_33 : f32 to vector<8x8xf32>
    %141 = arith.addf %139, %140 : vector<8x8xf32>
    %142 = arith.divf %135, %141 : vector<8x8xf32>
    %143 = vector.broadcast %105 : vector<8x1xf32> to vector<8x8xf32>
    %144 = vector.broadcast %85 : vector<1x8xf32> to vector<8x8xf32>
    %145 = arith.maximumf %143, %144 : vector<8x8xf32>
    %146 = vector.broadcast %95 : vector<8x1xf32> to vector<8x8xf32>
    %147 = vector.broadcast %75 : vector<1x8xf32> to vector<8x8xf32>
    %148 = arith.minimumf %146, %147 : vector<8x8xf32>
    %149 = arith.subf %145, %148 : vector<8x8xf32>
    %cst_34 = arith.constant 0.000000e+00 : f32
    %150 = vector.broadcast %cst_34 : f32 to vector<8x8xf32>
    %151 = arith.maximumf %149, %150 : vector<8x8xf32>
    %152 = vector.broadcast %110 : vector<8x1xf32> to vector<8x8xf32>
    %153 = vector.broadcast %90 : vector<1x8xf32> to vector<8x8xf32>
    %154 = arith.maximumf %152, %153 : vector<8x8xf32>
    %155 = vector.broadcast %100 : vector<8x1xf32> to vector<8x8xf32>
    %156 = vector.broadcast %80 : vector<1x8xf32> to vector<8x8xf32>
    %157 = arith.minimumf %155, %156 : vector<8x8xf32>
    %158 = arith.subf %154, %157 : vector<8x8xf32>
    %cst_35 = arith.constant 0.000000e+00 : f32
    %159 = vector.broadcast %cst_35 : f32 to vector<8x8xf32>
    %160 = arith.maximumf %158, %159 : vector<8x8xf32>
    %161 = arith.mulf %151, %160 : vector<8x8xf32>
    %162 = arith.subf %161, %139 : vector<8x8xf32>
    %cst_36 = arith.constant 1.000000e-07 : f32
    %163 = vector.broadcast %cst_36 : f32 to vector<8x8xf32>
    %164 = arith.addf %161, %163 : vector<8x8xf32>
    %165 = arith.divf %162, %164 : vector<8x8xf32>
    %166 = arith.subf %142, %165 : vector<8x8xf32>
    %cst_37 = arith.constant 5.000000e+00 : f32
    %167 = vector.broadcast %cst_37 : f32 to vector<8x8xf32>
    %168 = arith.mulf %167, %70 : vector<8x8xf32>
    %cst_38 = arith.constant 2.000000e+00 : f32
    %169 = vector.broadcast %cst_38 : f32 to vector<8x8xf32>
    %170 = arith.mulf %169, %43 : vector<8x8xf32>
    %171 = arith.addf %168, %170 : vector<8x8xf32>
    %cst_39 = arith.constant 0.000000e+00 : f32
    %172 = vector.broadcast %cst_39 : f32 to vector<8x8xf32>
    %173 = arith.subf %172, %166 : vector<8x8xf32>
    %cst_40 = arith.constant 2.000000e+00 : f32
    %174 = vector.broadcast %cst_40 : f32 to vector<8x8xf32>
    %175 = arith.mulf %174, %173 : vector<8x8xf32>
    %176 = arith.addf %171, %175 : vector<8x8xf32>
    %c0_41 = arith.constant 0 : index
    %c0_42 = arith.constant 0 : index
    %c0_43 = arith.constant 0 : index
    %177 = vector.load %arg5[%c0_41, %c0_42, %c0_43] : memref<1x8x8xf32, #tpu.memory_space<vmem>>, vector<1x8x8xf32>
    %178 = vector.shape_cast %177 : vector<1x8x8xf32> to vector<8x8xf32>
    %179 = vector.shape_cast %176 : vector<8x8xf32> to vector<1x8x8xf32>
    tpu.vector_store %arg5[%c0_41, %c0_42, %c0_43], %179 {strides = array<i32>} : memref<1x8x8xf32, #tpu.memory_space<vmem>>, vector<1x8x8xf32>,
    return
  }
  func.func @transform_0(%arg0: i32) -> (i32, i32, i32) {
    %c0_i32 = arith.constant 0 : i32
    %c0_i32_0 = arith.constant 0 : i32
    %c0_i32_1 = arith.constant 0 : i32
    return %arg0, %c0_i32, %c0_i32_0 : i32, i32, i32
  }
  func.func @transform_1(%arg0: i32) -> (i32, i32, i32) {
    %c0_i32 = arith.constant 0 : i32
    %c0_i32_0 = arith.constant 0 : i32
    %c0_i32_1 = arith.constant 0 : i32
    return %arg0, %c0_i32, %c0_i32_0 : i32, i32, i32
  }
  func.func @transform_2(%arg0: i32) -> (i32, i32, i32) {
    %c0_i32 = arith.constant 0 : i32
    %c0_i32_0 = arith.constant 0 : i32
    %c0_i32_1 = arith.constant 0 : i32
    return %arg0, %c0_i32, %c0_i32_0 : i32, i32, i32
  }
  func.func @transform_3(%arg0: i32) -> (i32, i32, i32) {
    %c0_i32 = arith.constant 0 : i32
    %c0_i32_0 = arith.constant 0 : i32
    %c0_i32_1 = arith.constant 0 : i32
    return %arg0, %c0_i32, %c0_i32_0 : i32, i32, i32
  }
  func.func @transform_4(%arg0: i32) -> (i32, i32, i32) {
    %c0_i32 = arith.constant 0 : i32
    %c0_i32_0 = arith.constant 0 : i32
    %c0_i32_1 = arith.constant 0 : i32
    return %arg0, %c0_i32, %c0_i32_0 : i32, i32, i32
  }
}

</mosaic_0001>

<bundles_post_ra>
// kernel: tpu_custom_call.1
= control target key start
LH: loop header
LB: loop body
LE: loop exit
PB: predicated region body
PF: predicated region fallthrough
CT: control target
= control target key end

     0   :  { %9 = vsyncpa [#allocation3], 0  ;;  %s932_s0 = inlined_call_operand.vmem [shape: f32[2,8,5], index: 0, kind: input, shape index: {}]   ;;  %s933_s1 = inlined_call_operand.vmem [shape: f32[2,4,8], index: 1, kind: input, shape index: {}]   ;;  %s934_s2 = inlined_call_operand.vmem [shape: f32[2,8,5], index: 2, kind: input, shape index: {}]   ;;  %s935_s3 = inlined_call_operand.vmem [shape: f32[2,8,4], index: 3, kind: input, shape index: {}]   ;;  %s936_s4 = inlined_call_operand.hbm [shape: f32[2,8,8], index: 4, kind: output, shape index: {}]  }
   0x1   :  { %11 = vsyncpa [#allocation3 + $0x1], 0  ;;  %s795_s15 = smov 0   ;;  %s797_s16 = smov 0  }
   0x2   :  { %s799_s17 = smov 0   ;;  %s801_s18 = smov 0  }
   0x3 LB: > { %s816_s19 = sadd.s32 4294967295, %s759_s18   ;;  %s607_s20 = sadd.s32 4294967294, %s759_s18   ;;  %s759_s18 = sphi %s801_s18, %s942_s18   ;;  %s755_s17 = sphi %s799_s17, %s941_s17   ;;  %s751_s16 = sphi %s797_s16, %s940_s16   ;;  %s747_s15 = sphi %s795_s15, %s939_s15  }
   0x4   : > { %s820_s21 = sadd.s32 1, %s759_s18   ;;  %s128_s22 = sadd.s32 1, %s755_s17 }
   0x5   : > { %s125_s23 = ssub.s32 %s759_s18, %s820_s21  ;;  %p138_p0 = scmp.ne.s32.totalorder %s755_s17, %s751_s16 }
   0x6   : > { %p126_p1 = scmp.eq.s32.totalorder %s125_s23, 0  ;;  %p139_p2 = scmp.eq.s32.totalorder %s816_s19, 1 }
   0x7   : > { %p144_p3 = scmp.ne.s32.totalorder %s751_s16, %s747_s15  ;;  %p145_p4 = scmp.eq.s32.totalorder %s607_s20, 1 }
   0x8   : > { %s831_s24 = scalar_select %p126_p1, %s755_s17, %s128_s22  }
   0x9   : > { %p833_p5 = por %p139_p2, %p138_p0  ;;  %p837_p6 = por %p145_p4, %p144_p3 }
   0xa   : > { %p610_p7 = scmp.ge.s32.totalorder %s759_s18, 1  ;;  %p191_p8 = scmp.lt.s32.totalorder %s759_s18, 3 }
   0xc   : > { %p192_p9 = pnand %p610_p7, %p191_p8 }
   0xd   : > { %p228_p10 = scmp.lt.s32.totalorder (!%p192_p9), %s816_s19, 1  ;;  %v761_v0 = vmov (!%p192_p9), 0   ;;  %v762_v1 = vmov (!%p192_p9), 1   ;;  %v763_v5 = vmov (!%p192_p9), 0.0   ;;  %vm764_vm0 = vmmov (!%p192_p9), 0   ;;  %s765_s9 = smov (!%p192_p9), 126  }
   0xe   : > { %195 = sbr.rel (%p192_p9) target bundleno = 433 (0x1b1), region = 36  ;;  %676 = vset.pattern.permute.xlu1 (!%p192_p9), %v761_v0  ;;  %677 = vset.pattern.permute.xlu0 (!%p192_p9), %v762_v1  ;;  %vm274_vm2 = vcmask (!%p192_p9), 39936   ;;  %s766_s13 = smov (!%p192_p9), 127   ;;  %v767_v35 = vmov (!%p192_p9), 3   ;;  %v768_v38 = vmov (!%p192_p9), 2   ;;  %v356_v43 = vlaneseq (!%p192_p9) }
   0xf   : > { %624 = vmatprep.subr.mxu0 (!%p192_p9), %v763_v5  ;;  %626 = vmatprep.mubr.msk.f32.mxu0 (!%p192_p9), %vm764_vm0, %v763_v5  ;;  %s619_s29 = sshll.u32 (!%p192_p9), %s816_s19, 7  ;;  %vm496_vm3 = vcmask (!%p192_p9), 64512  }
  0x10   : > { %v357_v46 = vshrl.u32 (!%p192_p9), %v356_v43, 7 }
  0x12   : > { %v368_v49 = vsub.s32 (!%p192_p9), 1, %v357_v46  ;;  %v358_v50 = vsub.s32 (!%p192_p9), 0, %v357_v46 }
  0x15   : > { %s846_s27 = scalar_select %p228_p10, %s816_s19, 1 }
  0x16   : > { %s769_s19 = smov [#allocation2]  }
  0x17   : > { %s850_s28 = sshll.u32 %s846_s27, 3  ;;  %s613_s14 = sshll.u32 %s846_s27, 2 }
  0x18   : > { %s243_s5 = scalar_lea.vmem %s935_s3, %s850_s28  ;;  %s231_s8 = scalar_lea.vmem %s932_s0, %s850_s28 }
  0x19   : > { %v856_v2 = vld [vmem:[%s243_s5] sm:$0xff]  ;;  %s239_s12 = scalar_lea.vmem %s934_s2, %s850_s28  ;;  %s235_s23 = scalar_lea.vmem %s933_s1, %s613_s14 }
  0x1a   : > { %v401_v3 = vmul.f32 0.5, %v856_v2  ;;  %v244_v4 = vld [vmem:[%s231_s8] sm:$0xff]  ;;  %s225_s27 = sand.u32 1, %s751_s16   ;;  %s890_s8 = scalar_lea.hbm %s936_s4, %s619_s29 }
  0x1b   : > { %v248_v6 = vand.u32 2147483647, %v244_v4  ;;  %vm255_vm1 = vcmp.ge.f32.partialorder %v244_v4, 0.0  ;;  %v246_v30 = vld [vmem:[%s239_s12] sm:$0xff]  ;;  %s611_s28 = sshll.u32 %s225_s27, 3  ;;  %s701_s11 = sshll.u32 %s769_s19, 4  ;;  %s702_s11 = int_to_ptr.vmem [resolvable:$false] %s701_s11 }
  0x1c   : > { %403 = vrot.lane.b32.xlu0 %v401_v3, %s765_s9  ;;  %v245_v41 = vld [vmem:[%s235_s23] sm:$0xf]  ;;  %s227_s30 = scalar_lea.vmem [#allocation2], %s611_s28  ;;  %s499_s9 = scalar_lea.sflag [#allocation3], %s225_s27 }
  0x1d   : > { %v249_v7 = vsub.f32 0.0, %v248_v6  ;;  %v395_v44 = vmul.f32 0.5, %v245_v41  ;;  %s512_s5 = sshll.u32 %s227_s30, 4  ;;  %s703_s12 = scalar_lea.vmem %s702_s11, 256  ;;  %s892_s5 = int_to_ptr.vmem [resolvable:$true] %s512_s5 }
  0x1e   : > { %s697_s10 = scalar_lea.vmem %s892_s5, 128  ;;  %p704_p0 = scmp.lt.s32.totalorder %s892_s5, %s702_s11 }
  0x1f   : > { %v250_v8 = vmul.f32 1.442695, %v249_v7  ;;  %v397_v47 = vrot.slane %v395_v44, 2  ;;  %p698_p11 = scmp.ne.s32.totalorder %s892_s5, %s697_s10  ;;  %p705_p1 = scmp.lt.s32.totalorder %s703_s12, %s697_s10 }
  0x21   : > { %685 = vpow2.f32 %v250_v8  ;;  %v399_v48 = vsub.f32 %v245_v41, %v397_v47  ;;  %v400_v51 = vadd.f32 %v397_v47, %v245_v41  ;;  %p699_p12 = pnand %p698_p11, %p833_p5  ;;  %p706_p2 = por %p705_p1, %p704_p0 }
  0x23   : > { %v457_v52 = vrot.slane %v399_v48, %v368_v49  ;;  %v437_v54 = vrot.slane %v399_v48, %v358_v50  ;;  %v448_v55 = vrot.slane %v400_v51, %v368_v49  ;;  %v408_v57 = vsub.f32 %v400_v51, %v399_v48  ;;  %p700_p13 = pneg %p699_p12 }
  0x24   : > { %v427_v58 = vrot.slane %v400_v51, %v358_v50 }
  0x25   : > { %v410_v63 = vrot.slane %v408_v57, 1  ;;  %p707_p3 = pnand %p706_p2, %p700_p13 }
  0x27   : > { %v412_v7 = vmul.f32 %v410_v63, %v408_v57 }
  0x2b   : > { %v686_v9 = vpop.eup %685 }
  0x2c   : > { %v252_v10 = vadd.f32 1.0, %v686_v9 }
  0x2e   : > { %687 = vrcp.f32 %v252_v10 }
  0x38   : > { %v688_v11 = vpop.eup %687 }
  0x39   : > { %v256_v12 = vmul.f32 %v688_v11, %v686_v9 }
  0x3b   : > { %v257_v13 = vsel %vm255_vm1, %v688_v11, %v256_v12  ;;  %v470_v12 = vrot.slane %v412_v7, %v358_v50 }
  0x3c   : > { %v260_v14 = vsub.f32 1.0, %v257_v13  ;;  %v268_v15 = vadd.f32 1e-08, %v257_v13  ;;  %v258_v18 = vmul.f32 %v257_v13, %v257_v13 }
  0x3e   : > { %v261_v16 = vadd.f32 1e-08, %v260_v14  ;;  %689 = vlog2.f32 %v268_v15  ;;  %v266_v17 = vmul.f32 %v260_v14, %v260_v14  ;;  %v259_v23 = vmul.f32 0.75, %v258_v18 }
  0x3f   : > { %v359_v15 = vrot.slane %v245_v41, %v358_v50 }
  0x40   : > { %691 = vlog2.f32 %v261_v16  ;;  %v267_v20 = vmul.f32 0.25, %v266_v17 }
  0x48   : > { %v690_v19 = vpop.eup %689 }
  0x49   : > { %v270_v21 = vmul.f32 0.6931472, %v690_v19 }
  0x4a   : > { %v692_v22 = vpop.eup %691 }
  0x4b   : > { %v263_v24 = vmul.f32 0.6931472, %v692_v22  ;;  %v271_v25 = vsub.f32 0.0, %v270_v21  ;;  %v369_v22 = vrot.slane %v245_v41, %v368_v49 }
  0x4d   : > { %v264_v26 = vsub.f32 0.0, %v263_v24  ;;  %v272_v27 = vmul.f32 %v271_v25, %v267_v20  ;;  %v390_v20 = vsub.s32 3, %v357_v46  ;;  %v379_v25 = vsub.s32 2, %v357_v46 }
  0x4f   : > { %v265_v28 = vmul.f32 %v264_v26, %v259_v23 }
  0x51   : > { %v273_v29 = vsub.f32 %v272_v27, %v265_v28  ;;  %v391_v28 = vrot.slane %v245_v41, %v390_v20 }
  0x53   : > { %625 = vmatpush3.xpose.msk.msra.mxu0 %vm274_vm2, %v273_v29 }
  0x56   : > { %627 = vmatmul.mubr.msk.f32.vlgmr.msra.gmra.mrb[0].mxu0 %vm274_vm2, %v246_v30 }
  0x8e   : > { %v404_v31 = vpop.permute.xlu0 %403 }
  0x8f   : > { %v406_v32 = vsub.f32 %v856_v2, %v404_v31  ;;  %v407_v33 = vadd.f32 %v404_v31, %v856_v2 }
  0x91   : > { %421 = vperm.xlu1 %676, %v407_v33   ;;  %v413_v34 = vsub.f32 %v407_v33, %v406_v32 }
  0x93   : > { %415 = vrot.lane.b32.xlu0 %v413_v34, %s766_s13 }
  0x95   : > { %431 = vperm.xlu1 %676, %v406_v32  }
  0x97   : > { %442 = vperm.xlu0 %677, %v407_v33  }
  0x99   : > { %678 = vset.pattern.permute.xlu1 %v762_v1 }
  0x9a   : > { %451 = vperm.xlu1 %678, %v406_v32   ;;  %v380_v32 = vrot.slane %v245_v41, %v379_v25 }
  0x9b   : > { %680 = vset.pattern.permute.xlu0 %v761_v0 }
  0x9c   : > { %353 = vperm.xlu0 %680, %v856_v2  }
  0x9e   : > { %679 = vset.pattern.permute.xlu1 %v761_v0 }
  0xa0   : > { %683 = vset.pattern.permute.xlu0 %v767_v35 }
  0xa1   : > { %385 = vperm.xlu0 %683, %v856_v2  }
  0xa5   : > { %684 = vset.pattern.permute.xlu0 %v761_v0 }
 0x105   : > { %v416_v36 = vpop.permute.xlu0 %415 }
 0x106   : > { %v418_v37 = vmul.f32 %v416_v36, %v413_v34 }
 0x108   : > { %464 = vperm.xlu1 %679, %v418_v37  }
 0x10c   : > { %681 = vset.pattern.permute.xlu1 %v762_v1 }
 0x10d   : > { %363 = vperm.xlu1 %681, %v856_v2  }
 0x110   : > { %v422_v42 = vpop.permute.xlu1 %421 }
 0x111   : > { %682 = vset.pattern.permute.xlu1 %v768_v38  ;;  %v476_v0 = vmax.f32 %v422_v42, %v427_v58  ;;  %v428_v5 = vmin.f32 %v422_v42, %v427_v58 }
 0x112   : > { %374 = vperm.xlu1 %682, %v856_v2  }
 0x114   : > { %v432_v45 = vpop.permute.xlu1 %431 }
 0x115   : > { %v477_v60 = vmin.f32 %v432_v45, %v437_v54  ;;  %v438_v2 = vmax.f32 %v432_v45, %v437_v54 }
 0x116   : > { %v443_v56 = vpop.permute.xlu0 %442 }
 0x117   : > { %v480_v61 = vmax.f32 %v443_v56, %v448_v55  ;;  %v449_v3 = vmin.f32 %v443_v56, %v448_v55  ;;  %v478_v4 = vsub.f32 %v476_v0, %v477_v60  ;;  %v439_v9 = vsub.f32 %v428_v5, %v438_v2 }
 0x119   : > { %v452_v53 = vpop.permute.xlu1 %451  ;;  %v479_v10 = vmax.f32 %v478_v4, 0.0  ;;  %v440_v14 = vmax.f32 %v439_v9, 0.0 }
 0x11a   : > { %v481_v59 = vmin.f32 %v452_v53, %v457_v52  ;;  %v458_v62 = vmax.f32 %v452_v53, %v457_v52 }
 0x11b   : > { %v354_v17 = vpop.permute.xlu0 %353 }
 0x11c   : > { %v482_v1 = vsub.f32 %v480_v61, %v481_v59  ;;  %v459_v6 = vsub.f32 %v449_v3, %v458_v62  ;;  %v360_v24 = vsub.f32 %v354_v17, %v359_v15 }
 0x11e   : > { %v483_v8 = vmax.f32 %v482_v1, 0.0  ;;  %v460_v11 = vmax.f32 %v459_v6, 0.0  ;;  %v361_v31 = vand.u32 2147483647, %v360_v24 }
 0x120   : > { %v484_v13 = vmul.f32 %v483_v8, %v479_v10  ;;  %v461_v18 = vmul.f32 %v460_v11, %v440_v14  ;;  %v386_v30 = vpop.permute.xlu0 %385 }
 0x121   : > { %v392_v34 = vsub.f32 %v386_v30, %v391_v28 }
 0x122   : > { %v486_v21 = vadd.f32 1e-07, %v484_v13 }
 0x124   : > { %693 = vrcp.f32 %v486_v21 }
 0x129   : > { %v878_v39 = vpop.f32.mrb[0].mxu0 }
 0x12a   : > { %v628_v40 = vpop.f32.mrb[1].mxu0  ;;  %v491_v47 = vmul.f32 2.0, %v878_v39 }
 0x12b   : > { %v393_v40 = vand.u32 2147483647, %v392_v34 }
 0x12e   : > { %v694_v44 = vpop.eup %693 }
 0x187   : > { %v465_v16 = vpop.permute.xlu1 %464 }
 0x188   : > { %v471_v19 = vadd.f32 %v470_v12, %v465_v16 }
 0x18a   : > { %v472_v23 = vsub.f32 %v471_v19, %v461_v18 }
 0x18c   : > { %v473_v26 = vadd.f32 1e-07, %v472_v23  ;;  %v364_v27 = vpop.permute.xlu1 %363  ;;  %v485_v42 = vsub.f32 %v484_v13, %v472_v23 }
 0x18d   : > { %v370_v29 = vsub.f32 %v364_v27, %v369_v22 }
 0x18e   : > { %695 = vrcp.f32 %v473_v26  ;;  %v488_v49 = vmul.f32 %v694_v44, %v485_v42 }
 0x18f   : > { %v371_v33 = vand.u32 2147483647, %v370_v29 }
 0x191   : > { %v375_v35 = vpop.permute.xlu1 %374  ;;  %v372_v36 = vadd.f32 %v371_v33, %v361_v31 }
 0x192   : > { %v381_v37 = vsub.f32 %v375_v35, %v380_v32 }
 0x194   : > { %v382_v38 = vand.u32 2147483647, %v381_v37 }
 0x196   : > { %v383_v43 = vadd.f32 %v382_v38, %v372_v36 }
 0x198   : > { %v696_v45 = vpop.eup %695  ;;  %v394_v46 = vadd.f32 %v393_v40, %v383_v43 }
 0x199   : > { %v475_v48 = vmul.f32 %v696_v45, %v461_v18 }
 0x19a   : > { %v490_v41 = vmul.f32 5.0, %v394_v46 }
 0x19b   : > { %v489_v50 = vsub.f32 %v475_v48, %v488_v49 }
 0x19c   : > { %v492_v51 = vadd.f32 %v491_v47, %v490_v41 }
 0x19d   : > { %v493_v52 = vsub.f32 0.0, %v489_v50 }
 0x19f   : > { %v494_v53 = vmul.f32 2.0, %v493_v52 }
 0x1a1   : > { %v495_v54 = vadd.f32 %v494_v53, %v492_v51 }
 0x1a3   : > { %497 = vst.msk [vmem:[%s227_s30] sm:$0xff] %vm496_vm3, %v495_v54 }
 0x1a4   : > { %710 = shalt.err (!%p707_p3)
}
 0x1a5   : > { %s711_s13 = scalar_lea.hbm %s890_s8, 128  ;;  %s715_s22 = scalar_lea.hbm %s936_s4, 256 }
 0x1a6   : > { %p712_p4 = scmp.ne.s32.totalorder %s890_s8, %s711_s13  ;;  %p716_p9 = scmp.lt.u32.totalorder %s890_s8, %s936_s4 }
 0x1a7   : > { %p717_p10 = scmp.lt.u32.totalorder %s715_s22, %s711_s13  ;;  %p719_p12 = scmp.lt.u32.totalorder %s711_s13, %s890_s8 }
 0x1a8   : > { %p713_p7 = pnand %p712_p4, %p833_p5 }
 0x1a9   : > { %p718_p11 = por %p717_p10, %p716_p9 }
 0x1aa   : > { %p714_p8 = pneg %p713_p7 }
 0x1ab   : > { %p720_p13 = por %p719_p12, %p718_p11 }
 0x1ad   : > { %p721_p0 = pnand %p720_p13, %p714_p8 }
 0x1af   : > { %724 = shalt.err (!%p721_p0)
}
 0x1b0   : > { %629 = dma.vmem_to_hbm [thread:$0]  (%p833_p5), %s892_s5, 128, %s890_s8, %s499_s9  }
 0x1b1 PF: > { %p635_p1 = scmp.ge.s32.totalorder %s759_s18, 2  ;;  %s524_s28 = sand.u32 1, %s747_s15  }
 0x1b2   : > { %s525_s29 = scalar_lea.sflag [#allocation3], %s524_s28 }
 0x1b3   : > { %p632_p2 = pnand %p635_p1, %p837_p6 }
 0x1b5   : > { %742 = dma.done.wait (!%p632_p2), %s525_s29, 128  }
 0x1b6   : > { %744 = vsyncadd (!%p632_p2), %s525_s29, 4294967168  ;;  %p14_p3 = scmp.ge.s32.totalorder %s820_s21, 4   ;;  %s939_s15 = smov %s751_s16 }
 0x1b7   : > { %s940_s16 = smov %s755_s17  ;;  %s941_s17 = smov %s831_s24 }
 0x1b8   : > { %s942_s18 = smov %s820_s21  ;;  %16 = sbr.rel (!%p14_p3) target bundleno = 3 (0x3), region = 80 }
 0x1bf   :  { %530 = vsyncpa [#allocation3], 1 }
 0x1c0   :  { %532 = vsyncpa [#allocation3 + $0x1], 1 }

</bundles_post_ra>
